<compile_context>
chip_gen: v6e
topology: v6e:2x2x1
jax: 0.10.0
libtpu: 0.0.40
codegen_flags: <defaults>
</compile_context>

<pallas_src>
import jax
import jax.numpy as jnp
from jax.experimental import pallas as pl
from jax.experimental.pallas import tpu as pltpu

EPS = 1e-5  # matches nn.BatchNorm1d / F.batch_norm default


def fc_net_kernel(x_ref, s_ref, st_ref, w1_ref, w2_ref, w3_ref, w4_ref, w5_ref,
                  vec_ref, out_ref):
    """One grid step == one block of MAML tasks (M = tasks_per_block * B rows).

    x_ref  : [M, D]      bf16  flattened task-block activations
    s_ref  : [Tp, M]     f32   segment-mean matrix (1/B on each task's rows, else 0)
    st_ref : [M, Tp]     f32   segment-expansion matrix (0/1)
    wN_ref : [K, N]      bf16  lane-padded weights (padded rows/cols are zero)
    vec_ref: [9, 256]    f32   rows 0-3 gamma1..4, rows 4-7 beta1..4, row 8 fc_out bias
    out_ref: [M, out_w]  f32   lane-dense (out_w = 128-padded num_classes)
    """
    S = s_ref[...]
    ST = st_ref[...]
    vecs = vec_ref[...]

    f1 = w1_ref.shape[1]
    f2 = w2_ref.shape[1]
    f3 = w3_ref.shape[1]
    f4 = w4_ref.shape[1]
    out_w = w5_ref.shape[1]

    def bn_relu(h, gamma, beta):
        # Per-task training-mode BatchNorm folded into scale/shift, then ReLU.
        # Segment sums ride the MXU (huge slack) instead of XLU reductions.
        mean = jnp.dot(S, h, preferred_element_type=jnp.float32)         # [Tp, F]
        ex2 = jnp.dot(S, h * h, preferred_element_type=jnp.float32)      # [Tp, F]
        var = jnp.maximum(ex2 - mean * mean, 0.0)                        # guard rounding
        scale = gamma * jax.lax.rsqrt(var + EPS)                         # EUP slot
        shift = beta - mean * scale
        scale_r = jnp.dot(ST, scale, preferred_element_type=jnp.float32)  # [M, F]
        shift_r = jnp.dot(ST, shift, preferred_element_type=jnp.float32)
        return jnp.maximum(h * scale_r + shift_r, 0.0)

    # fc1..fc4: linear bias omitted (exactly cancelled by training-mode BN mean-sub).
    h = jnp.dot(x_ref[...], w1_ref[...], preferred_element_type=jnp.float32)
    h = bn_relu(h, vecs[0:1, :f1], vecs[4:5, :f1])

    h = jnp.dot(h.astype(jnp.bfloat16), w2_ref[...], preferred_element_type=jnp.float32)
    h = bn_relu(h, vecs[1:2, :f2], vecs[5:6, :f2])

    h = jnp.dot(h.astype(jnp.bfloat16), w3_ref[...], preferred_element_type=jnp.float32)
    h = bn_relu(h, vecs[2:3, :f3], vecs[6:7, :f3])

    h = jnp.dot(h.astype(jnp.bfloat16), w4_ref[...], preferred_element_type=jnp.float32)
    h = bn_relu(h, vecs[3:4, :f4], vecs[7:8, :f4])

    # fc_out (lane-dense padded width, bias kept)
    out_ref[...] = (
        jnp.dot(h.astype(jnp.bfloat16), w5_ref[...], preferred_element_type=jnp.float32)
        + vecs[8:9, :out_w]
    )


def init_params(key, input_dim, num_classes):
    """Raw parameters mirroring the PyTorch module's layer shapes.

    Linear weights are stored transposed: [in_features, out_features].
    Biases / BN affine params are stored as [1, features].
    (BN affine params are randomized so the test exercises their plumbing.)
    """
    dims = [(input_dim, 256), (256, 128), (128, 64), (64, 64), (64, num_classes)]
    params = {}
    keys = jax.random.split(key, 4 * len(dims))
    for i, (fan_in, fan_out) in enumerate(dims):
        bound = 1.0 / jnp.sqrt(fan_in)
        params[f"w{i + 1}"] = jax.random.uniform(
            keys[4 * i], (fan_in, fan_out), jnp.float32, -bound, bound)
        params[f"b{i + 1}"] = jax.random.uniform(
            keys[4 * i + 1], (1, fan_out), jnp.float32, -bound, bound)
        if i < 4:
            params[f"g{i + 1}"] = jax.random.uniform(
                keys[4 * i + 2], (1, fan_out), jnp.float32, 0.5, 1.5)
            params[f"be{i + 1}"] = jax.random.uniform(
                keys[4 * i + 3], (1, fan_out), jnp.float32, -0.5, 0.5)
    return params


def _round_up(x, m):
    return ((x + m - 1) // m) * m


def prepare_params(params, num_classes):
    """One-time prep: bf16 weights lane-padded to 128-multiples, packed BN vectors."""
    f_true = [256, 128, 64, 64]                       # true feature widths
    f_pad = [max(128, _round_up(f, 128)) for f in f_true]   # 256,128,128,128
    out_pad = max(128, _round_up(num_classes, 128))
    vec_w = max(max(f_pad), out_pad)                  # 256

    def pad_w(w, rows, cols):
        buf = jnp.zeros((rows, cols), jnp.float32)
        return buf.at[: w.shape[0], : w.shape[1]].set(w)

    D = params["w1"].shape[0]
    w1 = pad_w(params["w1"], D, f_pad[0])
    w2 = pad_w(params["w2"], f_pad[0], f_pad[1])
    w3 = pad_w(params["w3"], f_pad[1], f_pad[2])
    w4 = pad_w(params["w4"], f_pad[2], f_pad[3])
    w5 = pad_w(params["w5"], f_pad[3], out_pad)

    # Packed per-layer vectors.  Padded gamma/beta lanes MUST stay zero so padded
    # features are exactly zero after BN*gamma and ReLU (no garbage leakage).
    vecs = jnp.zeros((9, vec_w), jnp.float32)
    for i in range(4):
        vecs = vecs.at[i, : f_true[i]].set(params[f"g{i + 1}"].reshape(-1))
        vecs = vecs.at[4 + i, : f_true[i]].set(params[f"be{i + 1}"].reshape(-1))
    vecs = vecs.at[8, :num_classes].set(params["b5"].reshape(-1))
    # NOTE: b1..b4 intentionally not packed — cancelled exactly by training-mode BN.

    return {
        "w1": w1.astype(jnp.bfloat16),
        "w2": w2.astype(jnp.bfloat16),
        "w3": w3.astype(jnp.bfloat16),
        "w4": w4.astype(jnp.bfloat16),
        "w5": w5.astype(jnp.bfloat16),
        "vecs": vecs,
    }


def fc_net_forward_tasks(x_tasks, prep, *, num_classes, target_rows=256):
    """x_tasks: [T, B, input_dim] -> logits [T, B, num_classes].

    BN statistics are computed per task (one module forward per MAML task); many
    tasks are processed per grid step so each matmul sees M = tasks_per_block*B rows.
    """
    T, B, D = x_tasks.shape
    w1, w2, w3, w4, w5 = prep["w1"], prep["w2"], prep["w3"], prep["w4"], prep["w5"]
    vecs = prep["vecs"]
    out_w = w5.shape[1]

    # Tasks per grid step: aim for M ~ target_rows (multiple of 256 fills v6e/v7x
    # MXU rows; 128 fills v5e).  Fall back to one full block if M isn't 8-aligned.
    tpb = max(1, min(T, max(1, target_rows // B)))
    if (tpb * B) % 8 != 0 and tpb < T:
        tpb = T
    n_blocks = pl.cdiv(T, tpb)
    t_pad = n_blocks * tpb
    m_rows = tpb * B
    tp = max(8, _round_up(tpb, 8))   # segment rows padded to the f32 sublane tile

    # bf16 activations (halves the only per-step HBM->VMEM stream); zero-pad tasks.
    x = x_tasks.astype(jnp.bfloat16)
    if t_pad != T:
        x = jnp.concatenate([x, jnp.zeros((t_pad - T, B, D), jnp.bfloat16)], axis=0)
    x2d = x.reshape(t_pad * B, D)

    # Segment matrices (constant across grid steps -> stay resident in VMEM).
    row_task = jnp.arange(m_rows, dtype=jnp.int32) // B
    seg_mask = jnp.arange(tp, dtype=jnp.int32)[:, None] == row_task[None, :]
    S = seg_mask.astype(jnp.float32) * (1.0 / B)     # [Tp, M]  -> S @ h = per-task mean
    ST = seg_mask.T.astype(jnp.float32)              # [M, Tp]  -> ST @ stats = row expand

    weights = (w1, w2, w3, w4, w5)
    mm_flops = 2 * t_pad * B * sum(int(w.shape[0]) * int(w.shape[1]) for w in weights)
    bn_widths = [int(w.shape[1]) for w in (w1, w2, w3, w4)]
    seg_flops = n_blocks * sum(8 * tp * m_rows * f for f in bn_widths)
    transcendentals = n_blocks * tp * sum(bn_widths)
    bytes_accessed = (
        int(x2d.size) * 2
        + sum(int(w.size) * 2 for w in weights)
        + (int(vecs.size) + int(S.size) + int(ST.size)) * 4
        + t_pad * B * out_w * 4
    )

    grid_spec = pltpu.PrefetchScalarGridSpec(
        num_scalar_prefetch=0,
        grid=(n_blocks,),
        in_specs=[
            pl.BlockSpec((m_rows, D), lambda i: (i, 0)),   # per-block activation slab
            pl.BlockSpec(S.shape, lambda i: (0, 0)),        # grid-invariant: resident
            pl.BlockSpec(ST.shape, lambda i: (0, 0)),
            pl.BlockSpec(w1.shape, lambda i: (0, 0)),
            pl.BlockSpec(w2.shape, lambda i: (0, 0)),
            pl.BlockSpec(w3.shape, lambda i: (0, 0)),
            pl.BlockSpec(w4.shape, lambda i: (0, 0)),
            pl.BlockSpec(w5.shape, lambda i: (0, 0)),
            pl.BlockSpec(vecs.shape, lambda i: (0, 0)),
        ],
        out_specs=pl.BlockSpec((m_rows, out_w), lambda i: (i, 0)),
    )

    out2d = pl.pallas_call(
        fc_net_kernel,
        out_shape=jax.ShapeDtypeStruct((t_pad * B, out_w), jnp.float32),
        grid_spec=grid_spec,
        compiler_params=pltpu.CompilerParams(
            # TODO(synk): on v7x consider pltpu.CORE_PARALLEL so the task-block axis
            # splits across the two TensorCores.
            dimension_semantics=("parallel",),
            vmem_limit_bytes=8 * 1024 * 1024,
        ),
        cost_estimate=pl.CostEstimate(
            flops=int(mm_flops + seg_flops),
            transcendentals=int(transcendentals),
            bytes_accessed=int(bytes_accessed),
        ),
    )(x2d, S, ST, w1, w2, w3, w4, w5, vecs)

    return out2d.reshape(t_pad, B, out_w)[:T, :, :num_classes]


def fc_net_forward(x, prep, *, num_classes):
    """Single forward call, identical to the PyTorch module: x.view(-1, input_dim)."""
    input_dim = prep["w1"].shape[0]
    x2d = x.reshape(-1, input_dim)
    return fc_net_forward_tasks(x2d[None], prep, num_classes=num_classes)[0]


# ----------------------------- references (pure JAX) -----------------------------

def _faithful_reference(x, params):
    """f32, with linear biases and two-pass variance: mirrors the PyTorch module."""
    input_dim = params["w1"].shape[0]
    h = x.reshape(-1, input_dim).astype(jnp.float32)
    for i in range(1, 5):
        h = h @ params[f"w{i}"] + params[f"b{i}"]
        mean = h.mean(axis=0, keepdims=True)
        var = ((h - mean) ** 2).mean(axis=0, keepdims=True)
        h = (h - mean) / jnp.sqrt(var + EPS) * params[f"g{i}"] + params[f"be{i}"]
        h = jnp.maximum(h, 0.0)
    return h @ params["w5"] + params["b5"]


def _matched_reference(x, params):
    """Mirrors the kernel math (bf16 matmul operands, folded BN, 1-pass clamped var)."""
    input_dim = params["w1"].shape[0]
    x2d = x.reshape(-1, input_dim)
    n = x2d.shape[0]
    h = x2d.astype(jnp.bfloat16)
    for i in range(1, 5):
        w = params[f"w{i}"].astype(jnp.bfloat16)
        h = jnp.dot(h, w, preferred_element_type=jnp.float32)
        mean = jnp.sum(h, axis=0, keepdims=True) / n
        ex2 = jnp.sum(h * h, axis=0, keepdims=True) / n
        var = jnp.maximum(ex2 - mean * mean, 0.0)
        scale = params[f"g{i}"] * jax.lax.rsqrt(var + EPS)
        shift = params[f"be{i}"] - mean * scale
        h = jnp.maximum(h * scale + shift, 0.0).astype(jnp.bfloat16)
    w5 = params["w5"].astype(jnp.bfloat16)
    return jnp.dot(h, w5, preferred_element_type=jnp.float32) + params["b5"]


if __name__ == "__main__":
    key = jax.random.PRNGKey(0)
    k_params, k_x, k_xt = jax.random.split(key, 3)

    num_classes = 4
    input_dim = 16
    batch = 8            # per-task batch
    num_tasks = 40       # exercises task batching (M=256), padding and a 2-step grid

    params = init_params(k_params, input_dim, num_classes)
    prep = prepare_params(params, num_classes)

    # --- single-call path (exactly the module's forward on one batch) ---
    x = jax.random.normal(k_x, (batch, input_dim), jnp.float32)
    out = jax.block_until_ready(fc_net_forward(x, prep, num_classes=num_classes))
    assert out.shape == (batch, num_classes)
    ref_tight = _matched_reference(x, params)
    ref_faith = _faithful_reference(x, params)
    assert jnp.allclose(out, ref_tight, atol=2e-2, rtol=2e-2), "mismatch vs matched ref"
    assert jnp.allclose(out, ref_faith, atol=5e-2, rtol=5e-2), "mismatch vs f32 ref"

    # --- multi-task path (per-task BN, 32 tasks per grid step, M = 256 rows) ---
    x_tasks = jax.random.normal(k_xt, (num_tasks, batch, input_dim), jnp.float32)
    out_tasks = jax.block_until_ready(
        fc_net_forward_tasks(x_tasks, prep, num_classes=num_classes))
    assert out_tasks.shape == (num_tasks, batch, num_classes)
    ref_tasks = jax.vmap(_matched_reference, in_axes=(0, None))(x_tasks, params)
    assert jnp.allclose(out_tasks, ref_tasks, atol=2e-2, rtol=2e-2), "task batch mismatch"

    print("KERNEL_OK")
</pallas_src>

<mosaic_0001>
module attributes {stable_mosaic.version = 11 : i64} {
  func.func @fc_net_kernel(%arg0: i32, %arg1: memref<8x16xbf16, #tpu.memory_space<vmem>>, %arg2: memref<8x8xf32, #tpu.memory_space<vmem>>, %arg3: memref<8x8xf32, #tpu.memory_space<vmem>>, %arg4: memref<16x256xbf16, #tpu.memory_space<vmem>>, %arg5: memref<256x128xbf16, #tpu.memory_space<vmem>>, %arg6: memref<128x128xbf16, #tpu.memory_space<vmem>>, %arg7: memref<128x128xbf16, #tpu.memory_space<vmem>>, %arg8: memref<128x128xbf16, #tpu.memory_space<vmem>>, %arg9: memref<9x256xf32, #tpu.memory_space<vmem>>, %arg10: memref<8x128xf32, #tpu.memory_space<vmem>>) attributes {dimension_semantics = [#tpu.dimension_semantics<parallel>], iteration_bounds = array<i64: 1>, scalar_prefetch = 0 : i64, scratch_operands = 0 : i64, tpu.core_type = #tpu.core_type<tc>, window_params = [{transform_indices = @transform_0, window_bounds = array<i64: 8, 16>}, {pipeline_mode = #tpu.pipeline_mode<synchronous>, transform_indices = @transform_1, window_bounds = array<i64: 8, 8>}, {pipeline_mode = #tpu.pipeline_mode<synchronous>, transform_indices = @transform_2, window_bounds = array<i64: 8, 8>}, {pipeline_mode = #tpu.pipeline_mode<synchronous>, transform_indices = @transform_3, window_bounds = array<i64: 16, 256>}, {pipeline_mode = #tpu.pipeline_mode<synchronous>, transform_indices = @transform_4, window_bounds = array<i64: 256, 128>}, {pipeline_mode = #tpu.pipeline_mode<synchronous>, transform_indices = @transform_5, window_bounds = array<i64: 128, 128>}, {pipeline_mode = #tpu.pipeline_mode<synchronous>, transform_indices = @transform_6, window_bounds = array<i64: 128, 128>}, {pipeline_mode = #tpu.pipeline_mode<synchronous>, transform_indices = @transform_7, window_bounds = array<i64: 128, 128>}, {pipeline_mode = #tpu.pipeline_mode<synchronous>, transform_indices = @transform_8, window_bounds = array<i64: 9, 256>}, {transform_indices = @transform_9, window_bounds = array<i64: 8, 128>}]} {
    %c0 = arith.constant 0 : index
    %c0_0 = arith.constant 0 : index
    %0 = vector.load %arg2[%c0, %c0_0] : memref<8x8xf32, #tpu.memory_space<vmem>>, vector<8x8xf32>
    %c0_1 = arith.constant 0 : index
    %c0_2 = arith.constant 0 : index
    %1 = vector.load %arg3[%c0_1, %c0_2] : memref<8x8xf32, #tpu.memory_space<vmem>>, vector<8x8xf32>
    %c0_3 = arith.constant 0 : index
    %c0_4 = arith.constant 0 : index
    %2 = vector.load %arg9[%c0_3, %c0_4] : memref<9x256xf32, #tpu.memory_space<vmem>>, vector<9x256xf32>
    %c0_5 = arith.constant 0 : index
    %c0_6 = arith.constant 0 : index
    %3 = vector.load %arg1[%c0_5, %c0_6] : memref<8x16xbf16, #tpu.memory_space<vmem>>, vector<8x16xbf16>
    %c0_7 = arith.constant 0 : index
    %c0_8 = arith.constant 0 : index
    %4 = vector.load %arg4[%c0_7, %c0_8] : memref<16x256xbf16, #tpu.memory_space<vmem>>, vector<16x256xbf16>
    %cst = arith.constant dense<0.000000e+00> : vector<8x256xf32>
    %5 = tpu.matmul %3, %4, %cst {dimension_numbers = #tpu.dot_dimension_numbers<[1], [0], [0], [1], [0, 0, 1, 1], [], []>} : vector<8x16xbf16>, vector<16x256xbf16>, vector<8x256xf32> -> vector<8x256xf32>
    %6 = vector.extract_strided_slice %2 {offsets = [0, 0], sizes = [1, 256], strides = [1, 1]} : vector<9x256xf32> to vector<1x256xf32>
    %7 = vector.extract_strided_slice %2 {offsets = [4, 0], sizes = [1, 256], strides = [1, 1]} : vector<9x256xf32> to vector<1x256xf32>
    %cst_9 = arith.constant dense<0.000000e+00> : vector<8x256xf32>
    %8 = tpu.matmul %0, %5, %cst_9 {dimension_numbers = #tpu.dot_dimension_numbers<[1], [0], [0], [1], [0, 0, 1, 1], [], []>} : vector<8x8xf32>, vector<8x256xf32>, vector<8x256xf32> -> vector<8x256xf32>
    %9 = arith.mulf %5, %5 : vector<8x256xf32>
    %cst_10 = arith.constant dense<0.000000e+00> : vector<8x256xf32>
    %10 = tpu.matmul %0, %9, %cst_10 {dimension_numbers = #tpu.dot_dimension_numbers<[1], [0], [0], [1], [0, 0, 1, 1], [], []>} : vector<8x8xf32>, vector<8x256xf32>, vector<8x256xf32> -> vector<8x256xf32>
    %11 = arith.mulf %8, %8 : vector<8x256xf32>
    %12 = arith.subf %10, %11 : vector<8x256xf32>
    %cst_11 = arith.constant 0.000000e+00 : f32
    %13 = vector.broadcast %cst_11 : f32 to vector<8x256xf32>
    %14 = arith.maximumf %12, %13 : vector<8x256xf32>
    %cst_12 = arith.constant 9.99999974E-6 : f32
    %15 = vector.broadcast %cst_12 : f32 to vector<8x256xf32>
    %16 = arith.addf %14, %15 : vector<8x256xf32>
    %17 = math.rsqrt %16 : vector<8x256xf32>
    %18 = vector.broadcast %6 : vector<1x256xf32> to vector<8x256xf32>
    %19 = arith.mulf %18, %17 : vector<8x256xf32>
    %20 = arith.mulf %8, %19 : vector<8x256xf32>
    %21 = vector.broadcast %7 : vector<1x256xf32> to vector<8x256xf32>
    %22 = arith.subf %21, %20 : vector<8x256xf32>
    %cst_13 = arith.constant dense<0.000000e+00> : vector<8x256xf32>
    %23 = tpu.matmul %1, %19, %cst_13 {dimension_numbers = #tpu.dot_dimension_numbers<[1], [0], [0], [1], [0, 0, 1, 1], [], []>} : vector<8x8xf32>, vector<8x256xf32>, vector<8x256xf32> -> vector<8x256xf32>
    %cst_14 = arith.constant dense<0.000000e+00> : vector<8x256xf32>
    %24 = tpu.matmul %1, %22, %cst_14 {dimension_numbers = #tpu.dot_dimension_numbers<[1], [0], [0], [1], [0, 0, 1, 1], [], []>} : vector<8x8xf32>, vector<8x256xf32>, vector<8x256xf32> -> vector<8x256xf32>
    %25 = arith.mulf %5, %23 : vector<8x256xf32>
    %26 = arith.addf %25, %24 : vector<8x256xf32>
    %cst_15 = arith.constant 0.000000e+00 : f32
    %27 = vector.broadcast %cst_15 : f32 to vector<8x256xf32>
    %28 = arith.maximumf %26, %27 : vector<8x256xf32>
    %29 = arith.truncf %28 : vector<8x256xf32> to vector<8x256xbf16>
    %c0_16 = arith.constant 0 : index
    %c0_17 = arith.constant 0 : index
    %30 = vector.load %arg5[%c0_16, %c0_17] : memref<256x128xbf16, #tpu.memory_space<vmem>>, vector<256x128xbf16>
    %cst_18 = arith.constant dense<0.000000e+00> : vector<8x128xf32>
    %31 = tpu.matmul %29, %30, %cst_18 {dimension_numbers = #tpu.dot_dimension_numbers<[1], [0], [0], [1], [0, 0, 1, 1], [], []>} : vector<8x256xbf16>, vector<256x128xbf16>, vector<8x128xf32> -> vector<8x128xf32>
    %32 = vector.extract_strided_slice %2 {offsets = [1, 0], sizes = [1, 128], strides = [1, 1]} : vector<9x256xf32> to vector<1x128xf32>
    %33 = vector.extract_strided_slice %2 {offsets = [5, 0], sizes = [1, 128], strides = [1, 1]} : vector<9x256xf32> to vector<1x128xf32>
    %cst_19 = arith.constant dense<0.000000e+00> : vector<8x128xf32>
    %34 = tpu.matmul %0, %31, %cst_19 {dimension_numbers = #tpu.dot_dimension_numbers<[1], [0], [0], [1], [0, 0, 1, 1], [], []>} : vector<8x8xf32>, vector<8x128xf32>, vector<8x128xf32> -> vector<8x128xf32>
    %35 = arith.mulf %31, %31 : vector<8x128xf32>
    %cst_20 = arith.constant dense<0.000000e+00> : vector<8x128xf32>
    %36 = tpu.matmul %0, %35, %cst_20 {dimension_numbers = #tpu.dot_dimension_numbers<[1], [0], [0], [1], [0, 0, 1, 1], [], []>} : vector<8x8xf32>, vector<8x128xf32>, vector<8x128xf32> -> vector<8x128xf32>
    %37 = arith.mulf %34, %34 : vector<8x128xf32>
    %38 = arith.subf %36, %37 : vector<8x128xf32>
    %cst_21 = arith.constant 0.000000e+00 : f32
    %39 = vector.broadcast %cst_21 : f32 to vector<8x128xf32>
    %40 = arith.maximumf %38, %39 : vector<8x128xf32>
    %cst_22 = arith.constant 9.99999974E-6 : f32
    %41 = vector.broadcast %cst_22 : f32 to vector<8x128xf32>
    %42 = arith.addf %40, %41 : vector<8x128xf32>
    %43 = math.rsqrt %42 : vector<8x128xf32>
    %44 = vector.broadcast %32 : vector<1x128xf32> to vector<8x128xf32>
    %45 = arith.mulf %44, %43 : vector<8x128xf32>
    %46 = arith.mulf %34, %45 : vector<8x128xf32>
    %47 = vector.broadcast %33 : vector<1x128xf32> to vector<8x128xf32>
    %48 = arith.subf %47, %46 : vector<8x128xf32>
    %cst_23 = arith.constant dense<0.000000e+00> : vector<8x128xf32>
    %49 = tpu.matmul %1, %45, %cst_23 {dimension_numbers = #tpu.dot_dimension_numbers<[1], [0], [0], [1], [0, 0, 1, 1], [], []>} : vector<8x8xf32>, vector<8x128xf32>, vector<8x128xf32> -> vector<8x128xf32>
    %cst_24 = arith.constant dense<0.000000e+00> : vector<8x128xf32>
    %50 = tpu.matmul %1, %48, %cst_24 {dimension_numbers = #tpu.dot_dimension_numbers<[1], [0], [0], [1], [0, 0, 1, 1], [], []>} : vector<8x8xf32>, vector<8x128xf32>, vector<8x128xf32> -> vector<8x128xf32>
    %51 = arith.mulf %31, %49 : vector<8x128xf32>
    %52 = arith.addf %51, %50 : vector<8x128xf32>
    %cst_25 = arith.constant 0.000000e+00 : f32
    %53 = vector.broadcast %cst_25 : f32 to vector<8x128xf32>
    %54 = arith.maximumf %52, %53 : vector<8x128xf32>
    %55 = arith.truncf %54 : vector<8x128xf32> to vector<8x128xbf16>
    %c0_26 = arith.constant 0 : index
    %c0_27 = arith.constant 0 : index
    %56 = vector.load %arg6[%c0_26, %c0_27] : memref<128x128xbf16, #tpu.memory_space<vmem>>, vector<128x128xbf16>
    %cst_28 = arith.constant dense<0.000000e+00> : vector<8x128xf32>
    %57 = tpu.matmul %55, %56, %cst_28 {dimension_numbers = #tpu.dot_dimension_numbers<[1], [0], [0], [1], [0, 0, 1, 1], [], []>} : vector<8x128xbf16>, vector<128x128xbf16>, vector<8x128xf32> -> vector<8x128xf32>
    %58 = vector.extract_strided_slice %2 {offsets = [2, 0], sizes = [1, 128], strides = [1, 1]} : vector<9x256xf32> to vector<1x128xf32>
    %59 = vector.extract_strided_slice %2 {offsets = [6, 0], sizes = [1, 128], strides = [1, 1]} : vector<9x256xf32> to vector<1x128xf32>
    %cst_29 = arith.constant dense<0.000000e+00> : vector<8x128xf32>
    %60 = tpu.matmul %0, %57, %cst_29 {dimension_numbers = #tpu.dot_dimension_numbers<[1], [0], [0], [1], [0, 0, 1, 1], [], []>} : vector<8x8xf32>, vector<8x128xf32>, vector<8x128xf32> -> vector<8x128xf32>
    %61 = arith.mulf %57, %57 : vector<8x128xf32>
    %cst_30 = arith.constant dense<0.000000e+00> : vector<8x128xf32>
    %62 = tpu.matmul %0, %61, %cst_30 {dimension_numbers = #tpu.dot_dimension_numbers<[1], [0], [0], [1], [0, 0, 1, 1], [], []>} : vector<8x8xf32>, vector<8x128xf32>, vector<8x128xf32> -> vector<8x128xf32>
    %63 = arith.mulf %60, %60 : vector<8x128xf32>
    %64 = arith.subf %62, %63 : vector<8x128xf32>
    %cst_31 = arith.constant 0.000000e+00 : f32
    %65 = vector.broadcast %cst_31 : f32 to vector<8x128xf32>
    %66 = arith.maximumf %64, %65 : vector<8x128xf32>
    %cst_32 = arith.constant 9.99999974E-6 : f32
    %67 = vector.broadcast %cst_32 : f32 to vector<8x128xf32>
    %68 = arith.addf %66, %67 : vector<8x128xf32>
    %69 = math.rsqrt %68 : vector<8x128xf32>
    %70 = vector.broadcast %58 : vector<1x128xf32> to vector<8x128xf32>
    %71 = arith.mulf %70, %69 : vector<8x128xf32>
    %72 = arith.mulf %60, %71 : vector<8x128xf32>
    %73 = vector.broadcast %59 : vector<1x128xf32> to vector<8x128xf32>
    %74 = arith.subf %73, %72 : vector<8x128xf32>
    %cst_33 = arith.constant dense<0.000000e+00> : vector<8x128xf32>
    %75 = tpu.matmul %1, %71, %cst_33 {dimension_numbers = #tpu.dot_dimension_numbers<[1], [0], [0], [1], [0, 0, 1, 1], [], []>} : vector<8x8xf32>, vector<8x128xf32>, vector<8x128xf32> -> vector<8x128xf32>
    %cst_34 = arith.constant dense<0.000000e+00> : vector<8x128xf32>
    %76 = tpu.matmul %1, %74, %cst_34 {dimension_numbers = #tpu.dot_dimension_numbers<[1], [0], [0], [1], [0, 0, 1, 1], [], []>} : vector<8x8xf32>, vector<8x128xf32>, vector<8x128xf32> -> vector<8x128xf32>
    %77 = arith.mulf %57, %75 : vector<8x128xf32>
    %78 = arith.addf %77, %76 : vector<8x128xf32>
    %cst_35 = arith.constant 0.000000e+00 : f32
    %79 = vector.broadcast %cst_35 : f32 to vector<8x128xf32>
    %80 = arith.maximumf %78, %79 : vector<8x128xf32>
    %81 = arith.truncf %80 : vector<8x128xf32> to vector<8x128xbf16>
    %c0_36 = arith.constant 0 : index
    %c0_37 = arith.constant 0 : index
    %82 = vector.load %arg7[%c0_36, %c0_37] : memref<128x128xbf16, #tpu.memory_space<vmem>>, vector<128x128xbf16>
    %cst_38 = arith.constant dense<0.000000e+00> : vector<8x128xf32>
    %83 = tpu.matmul %81, %82, %cst_38 {dimension_numbers = #tpu.dot_dimension_numbers<[1], [0], [0], [1], [0, 0, 1, 1], [], []>} : vector<8x128xbf16>, vector<128x128xbf16>, vector<8x128xf32> -> vector<8x128xf32>
    %84 = vector.extract_strided_slice %2 {offsets = [3, 0], sizes = [1, 128], strides = [1, 1]} : vector<9x256xf32> to vector<1x128xf32>
    %85 = vector.extract_strided_slice %2 {offsets = [7, 0], sizes = [1, 128], strides = [1, 1]} : vector<9x256xf32> to vector<1x128xf32>
    %cst_39 = arith.constant dense<0.000000e+00> : vector<8x128xf32>
    %86 = tpu.matmul %0, %83, %cst_39 {dimension_numbers = #tpu.dot_dimension_numbers<[1], [0], [0], [1], [0, 0, 1, 1], [], []>} : vector<8x8xf32>, vector<8x128xf32>, vector<8x128xf32> -> vector<8x128xf32>
    %87 = arith.mulf %83, %83 : vector<8x128xf32>
    %cst_40 = arith.constant dense<0.000000e+00> : vector<8x128xf32>
    %88 = tpu.matmul %0, %87, %cst_40 {dimension_numbers = #tpu.dot_dimension_numbers<[1], [0], [0], [1], [0, 0, 1, 1], [], []>} : vector<8x8xf32>, vector<8x128xf32>, vector<8x128xf32> -> vector<8x128xf32>
    %89 = arith.mulf %86, %86 : vector<8x128xf32>
    %90 = arith.subf %88, %89 : vector<8x128xf32>
    %cst_41 = arith.constant 0.000000e+00 : f32
    %91 = vector.broadcast %cst_41 : f32 to vector<8x128xf32>
    %92 = arith.maximumf %90, %91 : vector<8x128xf32>
    %cst_42 = arith.constant 9.99999974E-6 : f32
    %93 = vector.broadcast %cst_42 : f32 to vector<8x128xf32>
    %94 = arith.addf %92, %93 : vector<8x128xf32>
    %95 = math.rsqrt %94 : vector<8x128xf32>
    %96 = vector.broadcast %84 : vector<1x128xf32> to vector<8x128xf32>
    %97 = arith.mulf %96, %95 : vector<8x128xf32>
    %98 = arith.mulf %86, %97 : vector<8x128xf32>
    %99 = vector.broadcast %85 : vector<1x128xf32> to vector<8x128xf32>
    %100 = arith.subf %99, %98 : vector<8x128xf32>
    %cst_43 = arith.constant dense<0.000000e+00> : vector<8x128xf32>
    %101 = tpu.matmul %1, %97, %cst_43 {dimension_numbers = #tpu.dot_dimension_numbers<[1], [0], [0], [1], [0, 0, 1, 1], [], []>} : vector<8x8xf32>, vector<8x128xf32>, vector<8x128xf32> -> vector<8x128xf32>
    %cst_44 = arith.constant dense<0.000000e+00> : vector<8x128xf32>
    %102 = tpu.matmul %1, %100, %cst_44 {dimension_numbers = #tpu.dot_dimension_numbers<[1], [0], [0], [1], [0, 0, 1, 1], [], []>} : vector<8x8xf32>, vector<8x128xf32>, vector<8x128xf32> -> vector<8x128xf32>
    %103 = arith.mulf %83, %101 : vector<8x128xf32>
    %104 = arith.addf %103, %102 : vector<8x128xf32>
    %cst_45 = arith.constant 0.000000e+00 : f32
    %105 = vector.broadcast %cst_45 : f32 to vector<8x128xf32>
    %106 = arith.maximumf %104, %105 : vector<8x128xf32>
    %107 = arith.truncf %106 : vector<8x128xf32> to vector<8x128xbf16>
    %c0_46 = arith.constant 0 : index
    %c0_47 = arith.constant 0 : index
    %108 = vector.load %arg8[%c0_46, %c0_47] : memref<128x128xbf16, #tpu.memory_space<vmem>>, vector<128x128xbf16>
    %cst_48 = arith.constant dense<0.000000e+00> : vector<8x128xf32>
    %109 = tpu.matmul %107, %108, %cst_48 {dimension_numbers = #tpu.dot_dimension_numbers<[1], [0], [0], [1], [0, 0, 1, 1], [], []>} : vector<8x128xbf16>, vector<128x128xbf16>, vector<8x128xf32> -> vector<8x128xf32>
    %110 = vector.extract_strided_slice %2 {offsets = [8, 0], sizes = [1, 128], strides = [1, 1]} : vector<9x256xf32> to vector<1x128xf32>
    %111 = vector.broadcast %110 : vector<1x128xf32> to vector<8x128xf32>
    %112 = arith.addf %109, %111 : vector<8x128xf32>
    %c0_49 = arith.constant 0 : index
    %c0_50 = arith.constant 0 : index
    %113 = vector.load %arg10[%c0_49, %c0_50] : memref<8x128xf32, #tpu.memory_space<vmem>>, vector<8x128xf32>
    tpu.vector_store %arg10[%c0_49, %c0_50], %112 {strides = array<i32>} : memref<8x128xf32, #tpu.memory_space<vmem>>, vector<8x128xf32>,
    return
  }
  func.func @transform_0(%arg0: i32) -> (i32, i32) {
    %c0_i32 = arith.constant 0 : i32
    %c0_i32_0 = arith.constant 0 : i32
    return %arg0, %c0_i32 : i32, i32
  }
  func.func @transform_1(%arg0: i32) -> (i32, i32) {
    %c0_i32 = arith.constant 0 : i32
    %c0_i32_0 = arith.constant 0 : i32
    %c0_i32_1 = arith.constant 0 : i32
    return %c0_i32, %c0_i32_0 : i32, i32
  }
  func.func @transform_2(%arg0: i32) -> (i32, i32) {
    %c0_i32 = arith.constant 0 : i32
    %c0_i32_0 = arith.constant 0 : i32
    %c0_i32_1 = arith.constant 0 : i32
    return %c0_i32, %c0_i32_0 : i32, i32
  }
  func.func @transform_3(%arg0: i32) -> (i32, i32) {
    %c0_i32 = arith.constant 0 : i32
    %c0_i32_0 = arith.constant 0 : i32
    %c0_i32_1 = arith.constant 0 : i32
    return %c0_i32, %c0_i32_0 : i32, i32
  }
  func.func @transform_4(%arg0: i32) -> (i32, i32) {
    %c0_i32 = arith.constant 0 : i32
    %c0_i32_0 = arith.constant 0 : i32
    %c0_i32_1 = arith.constant 0 : i32
    return %c0_i32, %c0_i32_0 : i32, i32
  }
  func.func @transform_5(%arg0: i32) -> (i32, i32) {
    %c0_i32 = arith.constant 0 : i32
    %c0_i32_0 = arith.constant 0 : i32
    %c0_i32_1 = arith.constant 0 : i32
    return %c0_i32, %c0_i32_0 : i32, i32
  }
  func.func @transform_6(%arg0: i32) -> (i32, i32) {
    %c0_i32 = arith.constant 0 : i32
    %c0_i32_0 = arith.constant 0 : i32
    %c0_i32_1 = arith.constant 0 : i32
    return %c0_i32, %c0_i32_0 : i32, i32
  }
  func.func @transform_7(%arg0: i32) -> (i32, i32) {
    %c0_i32 = arith.constant 0 : i32
    %c0_i32_0 = arith.constant 0 : i32
    %c0_i32_1 = arith.constant 0 : i32
    return %c0_i32, %c0_i32_0 : i32, i32
  }
  func.func @transform_8(%arg0: i32) -> (i32, i32) {
    %c0_i32 = arith.constant 0 : i32
    %c0_i32_0 = arith.constant 0 : i32
    %c0_i32_1 = arith.constant 0 : i32
    return %c0_i32, %c0_i32_0 : i32, i32
  }
  func.func @transform_9(%arg0: i32) -> (i32, i32) {
    %c0_i32 = arith.constant 0 : i32
    %c0_i32_0 = arith.constant 0 : i32
    return %arg0, %c0_i32 : i32, i32
  }
}

</mosaic_0001>

<bundles_post_ra>
// kernel: tpu_custom_call.1
= control target key start
LH: loop header
LB: loop body
LE: loop exit
PB: predicated region body
PF: predicated region fallthrough
CT: control target
= control target key end

     0   :  { %14 = vsyncpa [#allocation3], 0  ;;  %s2757_s0 = inlined_call_operand.hbm [shape: bf16[8,16], index: 0, kind: input, shape index: {}]   ;;  %s2758_s1 = inlined_call_operand.hbm [shape: f32[8,8], index: 1, kind: input, shape index: {}]   ;;  %s2759_s2 = inlined_call_operand.hbm [shape: f32[8,8], index: 2, kind: input, shape index: {}]   ;;  %s2760_s3 = inlined_call_operand.hbm [shape: bf16[16,256], index: 3, kind: input, shape index: {}]   ;;  %s2761_s4 = inlined_call_operand.hbm [shape: bf16[256,128], index: 4, kind: input, shape index: {}]   ;;  %s2762_s5 = inlined_call_operand.hbm [shape: bf16[128,128], index: 5, kind: input, shape index: {}]   ;;  %s2763_s6 = inlined_call_operand.hbm [shape: bf16[128,128], index: 6, kind: input, shape index: {}]   ;;  %s2764_s7 = inlined_call_operand.hbm [shape: bf16[128,128], index: 7, kind: input, shape index: {}]   ;;  %s2765_s8 = inlined_call_operand.hbm [shape: f32[9,256], index: 8, kind: input, shape index: {}]   ;;  %s2766_s9 = inlined_call_operand.hbm [shape: f32[8,128], index: 9, kind: output, shape index: {}]  }
   0x1   :  { %15 = vsyncpa [#allocation6], 0 }
   0x2   :  { %16 = vsyncpa [#allocation9], 0 }
   0x3   :  { %17 = vsyncpa [#allocation12], 0 }
   0x4   :  { %18 = vsyncpa [#allocation15], 0 }
   0x5   :  { %19 = vsyncpa [#allocation4], 0  ;;  %s2490_s30 = smov [#allocation5]   ;;  %s2491_s11 = smov [#allocation8]  }
   0x6   :  { %s36_s10 = sshll.u32 %s2490_s30, 4  ;;  %s55_s12 = sshll.u32 %s2491_s11, 4  ;;  %s37_s10 = int_to_ptr.vmem [resolvable:$true] %s36_s10  ;;  %s56_s12 = int_to_ptr.vmem [resolvable:$true] %s55_s12 }
   0x7   :  { %s2286_s13 = scalar_lea.vmem %s37_s10, 128  ;;  %p2291_p1 = scmp.lt.s32.totalorder %s37_s10, %s37_s10 }
   0x8   :  { %p2287_p0 = scmp.ne.s32.totalorder %s37_s10, %s2286_s13  ;;  %p2292_p2 = scmp.lt.s32.totalorder %s2286_s13, %s2286_s13 }
   0xa   :  { %p2293_p3 = por %p2292_p2, %p2291_p1 }
   0xc   :  { %p2294_p4 = pnand %p2293_p3, %p2287_p0 }
   0xe   :  { %2297 = shalt.err (!%p2294_p4)
}
   0xf   :  { %39 = dma.hbm_to_vmem [thread:$0]  %s2758_s1, 128, %s37_s10, [#allocation6]  }
  0x10   :  { %s2306_s16 = scalar_lea.vmem %s56_s12, 256  ;;  %p2311_p6 = scmp.lt.s32.totalorder %s56_s12, %s56_s12 }
  0x11   :  { %p2307_p5 = scmp.ne.s32.totalorder %s56_s12, %s2306_s16  ;;  %p2312_p7 = scmp.lt.s32.totalorder %s2306_s16, %s2306_s16 }
  0x13   :  { %p2313_p8 = por %p2312_p7, %p2311_p6 }
  0x15   :  { %p2314_p9 = pnand %p2313_p8, %p2307_p5 }
  0x17   :  { %2317 = shalt.err (!%p2314_p9)
}
  0x18   :  { %s2492_s17 = smov 128   ;;  %s2493_s18 = smov 8  }
  0x19   :  { %61 = dma.hbm_to_vmem [thread:$0]  %s2760_s3, 256, %s56_s12, [#allocation9], %s2492_s17, %s2492_s17, %s2493_s18  }
  0x1a   :  { %s2494_s21 = smov [#allocation11]   ;;  %s2495_s23 = smov [#allocation14]  }
  0x1b   :  { %s79_s22 = sshll.u32 %s2494_s21, 4  ;;  %s103_s24 = sshll.u32 %s2495_s23, 4  ;;  %s80_s22 = int_to_ptr.vmem [resolvable:$true] %s79_s22  ;;  %s104_s24 = int_to_ptr.vmem [resolvable:$true] %s103_s24 }
  0x1c   :  { %s2326_s1 = scalar_lea.vmem %s80_s22, 1024  ;;  %p2331_p11 = scmp.lt.s32.totalorder %s80_s22, %s80_s22 }
  0x1d   :  { %p2327_p10 = scmp.ne.s32.totalorder %s80_s22, %s2326_s1  ;;  %p2332_p12 = scmp.lt.s32.totalorder %s2326_s1, %s2326_s1 }
  0x1f   :  { %p2333_p13 = por %p2332_p12, %p2331_p11 }
  0x21   :  { %p2334_p0 = pnand %p2333_p13, %p2327_p10 }
  0x23   :  { %2337 = shalt.err (!%p2334_p0)
}
  0x24   :  { %s2496_s25 = smov 64   ;;  %s2497_s26 = smov 4  }
  0x25   :  { %85 = dma.hbm_to_vmem [thread:$0]  %s2762_s5, 1024, %s80_s22, [#allocation12], %s2496_s25, %s2496_s25, %s2497_s26  }
  0x26   :  { %s2346_s28 = scalar_lea.vmem %s104_s24, 1024  ;;  %p2351_p2 = scmp.lt.s32.totalorder %s104_s24, %s104_s24 }
  0x27   :  { %p2347_p1 = scmp.ne.s32.totalorder %s104_s24, %s2346_s28  ;;  %p2352_p3 = scmp.lt.s32.totalorder %s2346_s28, %s2346_s28 }
  0x29   :  { %p2353_p4 = por %p2352_p3, %p2351_p2 }
  0x2b   :  { %p2354_p5 = pnand %p2353_p4, %p2347_p1 }
  0x2d   :  { %2357 = shalt.err (!%p2354_p5)
}
  0x2e   :  { %109 = dma.hbm_to_vmem [thread:$0]  %s2764_s7, 1024, %s104_s24, [#allocation15], %s2496_s25, %s2496_s25, %s2497_s26  }
  0x2f   :  { %s2498_s10 = smov [#allocation2]   ;;  %s2499_s12 = smov [#allocation7]  }
  0x30   :  { %s26_s11 = sshll.u32 %s2498_s10, 4  ;;  %s46_s13 = sshll.u32 %s2499_s12, 4  ;;  %s27_s11 = int_to_ptr.vmem [resolvable:$true] %s26_s11  ;;  %s47_s13 = int_to_ptr.vmem [resolvable:$true] %s46_s13 }
  0x31   :  { %s2366_s5 = scalar_lea.vmem %s27_s11, 64  ;;  %p2371_p7 = scmp.lt.s32.totalorder %s27_s11, %s27_s11 }
  0x32   :  { %p2367_p6 = scmp.ne.s32.totalorder %s27_s11, %s2366_s5  ;;  %p2372_p8 = scmp.lt.s32.totalorder %s2366_s5, %s2366_s5 }
  0x34   :  { %p2373_p9 = por %p2372_p8, %p2371_p7 }
  0x36   :  { %p2374_p10 = pnand %p2373_p9, %p2367_p6 }
  0x38   :  { %2377 = shalt.err (!%p2374_p10)
}
  0x39   :  { %29 = dma.hbm_to_vmem [thread:$0]  %s2757_s0, 64, %s27_s11, [#allocation3]  }
  0x3a   :  { %s2386_s16 = scalar_lea.vmem %s47_s13, 128  ;;  %p2391_p12 = scmp.lt.s32.totalorder %s47_s13, %s47_s13 }
  0x3b   :  { %p2387_p11 = scmp.ne.s32.totalorder %s47_s13, %s2386_s16  ;;  %p2392_p13 = scmp.lt.s32.totalorder %s2386_s16, %s2386_s16 }
  0x3d   :  { %p2393_p0 = por %p2392_p13, %p2391_p12 }
  0x3f   :  { %p2394_p1 = pnand %p2393_p0, %p2387_p11 }
  0x41   :  { %2397 = shalt.err (!%p2394_p1)
}
  0x42   :  { %49 = dma.hbm_to_vmem [thread:$0]  %s2759_s2, 128, %s47_s13, [#allocation6]  }
  0x43   :  { %s2500_s18 = smov [#allocation10]   ;;  %s2501_s20 = smov [#allocation13]  }
  0x44   :  { %s67_s19 = sshll.u32 %s2500_s18, 4  ;;  %s91_s21 = sshll.u32 %s2501_s20, 4  ;;  %s68_s19 = int_to_ptr.vmem [resolvable:$true] %s67_s19  ;;  %s92_s21 = int_to_ptr.vmem [resolvable:$true] %s91_s21 }
  0x45   :  { %s2406_s22 = scalar_lea.vmem %s68_s19, 2048  ;;  %p2411_p3 = scmp.lt.s32.totalorder %s68_s19, %s68_s19 }
  0x46   :  { %p2407_p2 = scmp.ne.s32.totalorder %s68_s19, %s2406_s22  ;;  %p2412_p4 = scmp.lt.s32.totalorder %s2406_s22, %s2406_s22 }
  0x48   :  { %p2413_p5 = por %p2412_p4, %p2411_p3 }
  0x4a   :  { %p2414_p6 = pnand %p2413_p5, %p2407_p2 }
  0x4c   :  { %2417 = shalt.err (!%p2414_p6)
}
  0x4d   :  { %73 = dma.hbm_to_vmem [thread:$0]  %s2761_s4, 2048, %s68_s19, [#allocation9], %s2496_s25, %s2496_s25, %s2497_s26  }
  0x4e   :  { %s2426_s2 = scalar_lea.vmem %s92_s21, 1024  ;;  %p2431_p8 = scmp.lt.s32.totalorder %s92_s21, %s92_s21 }
  0x4f   :  { %p2427_p7 = scmp.ne.s32.totalorder %s92_s21, %s2426_s2  ;;  %p2432_p9 = scmp.lt.s32.totalorder %s2426_s2, %s2426_s2 }
  0x51   :  { %p2433_p10 = por %p2432_p9, %p2431_p8 }
  0x53   :  { %p2434_p11 = pnand %p2433_p10, %p2427_p7 }
  0x55   :  { %2437 = shalt.err (!%p2434_p11)
}
  0x56   :  { %97 = dma.hbm_to_vmem [thread:$0]  %s2763_s6, 1024, %s92_s21, [#allocation12], %s2496_s25, %s2496_s25, %s2497_s26  }
  0x57   :  { %s2502_s27 = smov [#allocation16]  }
  0x58   :  { %s115_s3 = sshll.u32 %s2502_s27, 4  ;;  %s116_s3 = int_to_ptr.vmem [resolvable:$true] %s115_s3 }
  0x59   :  { %s2446_s28 = scalar_lea.vmem %s116_s3, 512  ;;  %p2451_p13 = scmp.lt.s32.totalorder %s116_s3, %s116_s3 }
  0x5a   :  { %p2447_p12 = scmp.ne.s32.totalorder %s116_s3, %s2446_s28  ;;  %p2452_p0 = scmp.lt.s32.totalorder %s2446_s28, %s2446_s28 }
  0x5c   :  { %p2453_p1 = por %p2452_p0, %p2451_p13 }
  0x5e   :  { %p2454_p2 = pnand %p2453_p1, %p2447_p12 }
  0x60   :  { %2457 = shalt.err (!%p2454_p2)
}
  0x61   :  { %s2503_s4 = smov 256   ;;  %s2504_s29 = smov 16  }
  0x62   :  { %121 = dma.hbm_to_vmem [thread:$0]  %s2765_s8, 512, %s116_s3, [#allocation15], %s2503_s4, %s2503_s4, %s2504_s29  }
  0x63   :  { %2478 = dma.done.wait [#allocation3], 64  }
  0x64   :  { %2479 = vsyncadd [#allocation3], 4294967232 }
  0x65   :  { %2480 = dma.done.wait [#allocation6], 256  }
  0x66   :  { %2481 = vsyncadd [#allocation6], 4294967040 }
  0x67   :  { %2482 = dma.done.wait [#allocation9], 2304  }
  0x68   :  { %2483 = vsyncadd [#allocation9], 4294964992 }
  0x69   :  { %2484 = dma.done.wait [#allocation12], 2048  }
  0x6a   :  { %2485 = vsyncadd [#allocation12], 4294965248 }
  0x6b   :  { %2486 = dma.done.wait [#allocation15], 1536  }
  0x6c   :  { %2487 = vsyncadd [#allocation15], 4294965760  ;;  %v2505_v0 = vmov 0   ;;  %v2225_v1 = vld [vmem:[#allocation8 + $0x4] ss:$8 sps:$4 sm:$0xff]   ;;  %vm168_vm0 = vcmask 130048   ;;  %v371_v23 = vlaneseq }
  0x6d   :  { %204 = vmatprep.mubr.bf16.mxu0 %v2505_v0  ;;  %v2227_v2 = vld [vmem:[#allocation8] ss:$8 sps:$4 sm:$0xff]   ;;  %v155_v3 = vld [vmem:[#allocation2] sm:$0xf]  ;;  %186 = vmatprep.subr.bf16.mxu0 %v2225_v1  ;;  %v2506_v4 = vmov 0.0   ;;  %v2604_v7 = vld [vmem:[#allocation5] sm:$0xff] }
  0x6e   :  { %187 = vmatpush1.bf16.msra.mxu0 %v2227_v2  ;;  %460 = vmatprep.mubr.f32.mxu1 %v2506_v4  ;;  %vm213_vm1 = vcmask 64512   ;;  %v2618_v25 = vshrl.u32 %v371_v23, 7  ;;  %v2621_v27 = vld [vmem:[#allocation16] sm:$0xff]  ;;  %v153_v28 = vld [vmem:[#allocation16 + $0x8] sm:$0xff]  ;;  %v2228_v37 = vld [vmem:[#allocation10 + $0x78] sm:$0xff]   ;;  %vm2507_vm2 = vmmov 0  }
  0x6f   :  { %v2626_v40 = vld [vmem:[#allocation7] sm:$0xff]  ;;  %v2229_v41 = vld [vmem:[#allocation10 + $0x38] sm:$0xff]   ;;  %v2230_v43 = vld [vmem:[#allocation10 + $0x70] sm:$0xff]   ;;  %s2508_s6 = smov [#allocation17]  }
  0x70   :  { %v373_v26 = vsub.s32 0, %v2618_v25  ;;  %v385_v32 = vsub.s32 4, %v2618_v25  ;;  %v2231_v46 = vld [vmem:[#allocation10 + $0x30] sm:$0xff]   ;;  %v2232_v47 = vld [vmem:[#allocation10 + $0x68] sm:$0xff]   ;;  %v2234_v49 = vld [vmem:[#allocation10 + $0x60] sm:$0xff]   ;;  %v862_v23 = vsub.s32 1, %v2618_v25 }
  0x71   :  { %1955 = vmatmul.mubr.msk.bf16.vlgmr.msra.gmra.mxu0 %vm168_vm0, %v155_v3  ;;  %v2233_v48 = vld [vmem:[#allocation10 + $0x28] sm:$0xff]   ;;  %v2235_v50 = vld [vmem:[#allocation10 + $0x20] sm:$0xff]   ;;  %v2236_v51 = vld [vmem:[#allocation10 + $0x58] sm:$0xff]   ;;  %s1940_s8 = sshll.u32 %s2508_s6, 4  ;;  %s1941_s8 = int_to_ptr.vmem [resolvable:$true] %s1940_s8 }
  0x72   :  { %281 = vmatprep.mubr.f32.mxu0 %v2506_v4  ;;  %v374_v29 = vrot.slane %v2621_v27, %v373_v26  ;;  %v378_v30 = vrot.slane %v153_v28, %v373_v26  ;;  %v390_v36 = vrot.slane %v153_v28, %v385_v32  ;;  %v386_v39 = vrot.slane %v2621_v27, %v385_v32  ;;  %v2237_v52 = vld [vmem:[#allocation10 + $0x18] sm:$0xff]   ;;  %v2238_v53 = vld [vmem:[#allocation10 + $0x50] sm:$0xff]   ;;  %v2240_v55 = vld [vmem:[#allocation10 + $0x48] sm:$0xff]   ;;  %s2458_s25 = scalar_lea.vmem %s1941_s8, 128  ;;  %p2463_p4 = scmp.lt.s32.totalorder %s1941_s8, %s1941_s8 }
  0x73   :  { %v2239_v54 = vld [vmem:[#allocation10 + $0x10] sm:$0xff]   ;;  %v2241_v56 = vld [vmem:[#allocation10 + $0x8] sm:$0xff]   ;;  %v2242_v57 = vld [vmem:[#allocation10 + $0x40] sm:$0xff]   ;;  %v868_v26 = vsub.s32 5, %v2618_v25  ;;  %p2459_p3 = scmp.ne.s32.totalorder %s1941_s8, %s2458_s25  ;;  %p2464_p5 = scmp.lt.s32.totalorder %s2458_s25, %s2458_s25 }
  0x74   :  { %v2243_v58 = vld [vmem:[#allocation10] sm:$0xff]  }
  0x75   :  { %p2465_p6 = por %p2464_p5, %p2463_p4 }
  0x77   :  { %p2466_p7 = pnand %p2465_p6, %p2459_p3 }
 0x131   :  { %v2600_v5 = vpop.f32.mrf.mxu0 }
 0x132   :  { %v288_v9 = vmul.f32 %v2600_v5, %v2600_v5 }
 0x133   :  { %v2602_v6 = vpop.f32.mrf.mxu0 }
 0x134   :  { %v289_v8 = vmul.f32 %v2602_v6, %v2602_v6  ;;  %247 = vmatprep.subr.mxu0 %v2602_v6 }
 0x135   :  { %v210_v10 = vpop.f32.mrf.mxu0  ;;  %248 = vmatpush1.msra.mxu0 %v2600_v5 }
 0x136   :  { %1956 = vmatmul.mubr.msk.f32.vlgmr.msra.gmra.mxu0 %vm213_vm1, %v2604_v7  ;;  %320 = vmatprep.subr.mxu0 %v289_v8 }
 0x137   :  { %v211_v11 = vpop.f32.mrf.mxu0  ;;  %321 = vmatpush1.msra.mxu0 %v288_v9  ;;  %354 = vmatprep.mubr.f32.mxu0 %v2506_v4 }
 0x13a   :  { %1957 = vmatmul.mubr.msk.f32.vlgmr.msra.gmra.mxu0 %vm213_vm1, %v2604_v7 }
 0x13b   :  { %531 = vmatprep.mubr.f32.mxu0 %v2506_v4 }
 0x1f6   :  { %v283_v12 = vpop.f32.mrf.mxu0 }
 0x1f7   :  { %v361_v14 = vmul.f32 %v283_v12, %v283_v12 }
 0x1f8   :  { %v285_v13 = vpop.f32.mrf.mxu0 }
 0x1f9   :  { %v362_v16 = vmul.f32 %v285_v13, %v285_v13 }
 0x1fa   :  { %v356_v15 = vpop.f32.mrf.mxu0 }
 0x1fb   :  { %v363_v17 = vsub.f32 %v356_v15, %v361_v14 }
 0x1fc   :  { %v358_v18 = vpop.f32.mrf.mxu0 }
 0x1fd   :  { %v365_v19 = vmax.f32 %v363_v17, 0.0  ;;  %v364_v20 = vsub.f32 %v358_v18, %v362_v16 }
 0x1ff   :  { %v367_v21 = vadd.f32 1e-05, %v365_v19  ;;  %v366_v22 = vmax.f32 %v364_v20, 0.0 }
 0x201   :  { %2268 = vrsqrt.f32 %v367_v21  ;;  %v368_v24 = vadd.f32 1e-05, %v366_v22 }
 0x203   :  { %2270 = vrsqrt.f32 %v368_v24  ;;  %v863_v24 = vrot.slane %v2621_v27, %v862_v23 }
 0x20e   :  { %v2269_v31 = vpop.eup %2268 }
 0x20f   :  { %v379_v33 = vmul.f32 %v2269_v31, %v374_v29 }
 0x210   :  { %v2271_v34 = vpop.eup %2270 }
 0x211   :  { %v380_v35 = vmul.f32 %v2271_v34, %v378_v30  ;;  %v381_v38 = vmul.f32 %v379_v33, %v283_v12  ;;  %v869_v30 = vrot.slane %v2621_v27, %v868_v26  ;;  %v2245_v34 = vld [vmem:[#allocation11 + $0x30] sm:$0xff]  }
 0x213   :  { %v382_v42 = vmul.f32 %v380_v35, %v285_v13  ;;  %426 = vmatprep.subr.mxu1 %v380_v35  ;;  %v391_v45 = vsub.f32 %v386_v39, %v381_v38  ;;  %v2246_v35 = vld [vmem:[#allocation11 + $0x28] sm:$0xff]   ;;  %v2249_v38 = vld [vmem:[#allocation11 + $0x10] sm:$0xff]  }
 0x214   :  { %427 = vmatpush1.msra.mxu1 %v379_v33  ;;  %v2244_v33 = vld [vmem:[#allocation11 + $0x38] sm:$0xff]   ;;  %v2250_v39 = vld [vmem:[#allocation11 + $0x8] sm:$0xff]  }
 0x215   :  { %1958 = vmatmul.mubr.msk.f32.vlgmr.msra.gmra.mxu1 %vm213_vm1, %v2626_v40  ;;  %v392_v44 = vsub.f32 %v390_v36, %v382_v42  ;;  %2013 = vmatprep.subr.bf16.mxu1 %v2228_v37  ;;  %v2247_v36 = vld [vmem:[#allocation11 + $0x20] sm:$0xff]   ;;  %v2248_v37 = vld [vmem:[#allocation11 + $0x18] sm:$0xff]  }
 0x216   :  { %2014 = vmatpush3.bf16.msra.mxu1 %v2229_v41  ;;  %v2251_v41 = vld [vmem:[#allocation11] sm:$0xff]  }
 0x217   :  { %497 = vmatprep.subr.mxu0 %v392_v44  ;;  %2015 = vmatprep.subr.bf16.mxu1 %v2230_v43 }
 0x218   :  { %498 = vmatpush1.msra.mxu0 %v391_v45 }
 0x219   :  { %1959 = vmatmul.mubr.msk.f32.vlgmr.msra.gmra.mxu0 %vm213_vm1, %v2626_v40  ;;  %2086 = vmatprep.subr.mxu0 %v2506_v4 }
 0x21a   :  { %2016 = vmatpush3.bf16.msra.mxu1 %v2231_v46  ;;  %2088 = vmatprep.mubr.msk.f32.mxu0 %vm2507_vm2, %v2506_v4 }
 0x21b   :  { %2017 = vmatprep.subr.bf16.mxu1 %v2232_v47 }
 0x21e   :  { %2018 = vmatpush3.bf16.msra.mxu1 %v2233_v48 }
 0x21f   :  { %2019 = vmatprep.subr.bf16.mxu1 %v2234_v49 }
 0x222   :  { %2020 = vmatpush3.bf16.msra.mxu1 %v2235_v50 }
 0x223   :  { %2021 = vmatprep.subr.bf16.mxu1 %v2236_v51 }
 0x226   :  { %2022 = vmatpush3.bf16.msra.mxu1 %v2237_v52 }
 0x227   :  { %2023 = vmatprep.subr.bf16.mxu1 %v2238_v53 }
 0x22a   :  { %2024 = vmatpush3.bf16.msra.mxu1 %v2239_v54 }
 0x22b   :  { %2025 = vmatprep.subr.bf16.mxu1 %v2240_v55  ;;  %v2252_v55 = vld [vmem:[#allocation13 + $0x38] sm:$0xff]  }
 0x22e   :  { %2026 = vmatpush3.bf16.msra.mxu1 %v2241_v56  ;;  %v2253_v56 = vld [vmem:[#allocation13 + $0x30] sm:$0xff]  }
 0x22f   :  { %2027 = vmatprep.subr.bf16.mxu1 %v2242_v57  ;;  %v2254_v57 = vld [vmem:[#allocation13 + $0x28] sm:$0xff]  }
 0x232   :  { %2028 = vmatpush3.bf16.msra.mxu1 %v2243_v58  ;;  %v2255_v58 = vld [vmem:[#allocation13 + $0x20] sm:$0xff]  }
 0x233   :  { %2126 = vmatprep.subr.mxu1 %v2506_v4 }
 0x2d5   :  { %v462_v59 = vpop.f32.mrf.mxu1 }
 0x2d6   :  { %v538_v61 = vmul.f32 %v462_v59, %v2600_v5  ;;  %v2256_v59 = vld [vmem:[#allocation13 + $0x18] sm:$0xff]  }
 0x2d7   :  { %v464_v60 = vpop.f32.mrf.mxu1 }
 0x2d8   :  { %v539_v63 = vmul.f32 %v464_v60, %v2602_v6 }
 0x2d9   :  { %v533_v62 = vpop.f32.mrf.mxu0 }
 0x2da   :  { %v540_v0 = vadd.f32 %v538_v61, %v533_v62 }
 0x2db   :  { %v535_v1 = vpop.f32.mrf.mxu0 }
 0x2dc   :  { %v541_v2 = vadd.f32 %v539_v63, %v535_v1  ;;  %v542_v3 = vmax.f32 %v540_v0, 0.0 }
 0x2de   :  { %v543_v8 = vmax.f32 %v541_v2, 0.0  ;;  %v544_v10 = vpack.c.bf16 %v542_v3, %v542_v3 }
 0x2e0   :  { %v545_v9 = vpack.c.bf16 %v543_v8, %v543_v8  ;;  %v1267_v8 = vsub.s32 2, %v2618_v25 }
 0x2e2   :  { %706 = vmatprep.mubr.bf16.mxu1 %v545_v9  ;;  %v1268_v9 = vrot.slane %v2621_v27, %v1267_v8 }
 0x2e3   :  { %707 = vmatmul.mubr.bf16.vlgmr.msra.gmra.mxu1 %v544_v10  ;;  %v1273_v10 = vsub.s32 6, %v2618_v25 }
 0x2e4   :  { %2128 = vmatprep.mubr.msk.f32.mxu1 %vm2507_vm2, %v2506_v4 }
 0x3a3   :  { %v2029_v5 = vpop.f32.mrf.mxu1 }
 0x3a5   :  { %v2030_v11 = vpop.f32.mrf.mxu1 }
 0x3a6   :  { %v2640_v12 = vadd.f32 %v2030_v11, %v2029_v5 }
 0x3a7   :  { %v2032_v6 = vpop.f32.mrf.mxu1 }
 0x3a8   :  { %v784_v13 = vmul.f32 %v2640_v12, %v2640_v12  ;;  %2087 = vmatpush3.msra.mxu0 %v2640_v12 }
 0x3a9   :  { %v2033_v14 = vpop.f32.mrf.mxu1  ;;  %2089 = vmatmul.mubr.msk.f32.vlgmr.msra.gmra.mxu0 %vm213_vm1, %v2604_v7  ;;  %2091 = vmatprep.subr.mxu0 %v2506_v4 }
 0x3aa   :  { %2092 = vmatpush3.msra.mxu0 %v784_v13  ;;  %2093 = vmatprep.mubr.msk.f32.mxu0 %vm2507_vm2, %v2506_v4  ;;  %v2257_v14 = vld [vmem:[#allocation13 + $0x10] sm:$0xff]  }
 0x3ab   :  { %2096 = vmatprep.subr.mxu0 %v2506_v4 }
 0x3ad   :  { %2094 = vmatmul.mubr.msk.f32.vlgmr.msra.gmra.mxu0 %vm213_vm1, %v2604_v7 }
 0x3ae   :  { %2098 = vmatprep.mubr.msk.f32.mxu0 %vm2507_vm2, %v2506_v4 }
 0x469   :  { %v780_v15 = vpop.f32.mrf.mxu0 }
 0x46a   :  { %v855_v17 = vmul.f32 %v780_v15, %v780_v15 }
 0x46b   :  { %v2090_v16 = vpop.f32.mrf.mxu0 }
 0x46c   :  { %v2259_v16 = vld [vmem:[#allocation13] sm:$0xff]  }
 0x46d   :  { %v851_v18 = vpop.f32.mrf.mxu0 }
 0x46e   :  { %v856_v19 = vsub.f32 %v851_v18, %v855_v17 }
 0x46f   :  { %v2095_v20 = vpop.f32.mrf.mxu0 }
 0x470   :  { %v857_v21 = vmax.f32 %v856_v19, 0.0 }
 0x472   :  { %v858_v22 = vadd.f32 1e-05, %v857_v21 }
 0x474   :  { %2272 = vrsqrt.f32 %v858_v22 }
 0x481   :  { %v2273_v28 = vpop.eup %2272 }
 0x482   :  { %v864_v29 = vmul.f32 %v2273_v28, %v863_v24 }
 0x484   :  { %2097 = vmatpush3.msra.mxu0 %v864_v29  ;;  %v865_v31 = vmul.f32 %v864_v29, %v780_v15  ;;  %v2258_v15 = vld [vmem:[#allocation13 + $0x8] sm:$0xff]  }
 0x485   :  { %2099 = vmatmul.mubr.msk.f32.vlgmr.msra.gmra.mxu0 %vm213_vm1, %v2626_v40  ;;  %2101 = vmatprep.subr.mxu0 %v2506_v4 }
 0x486   :  { %v870_v32 = vsub.f32 %v869_v30, %v865_v31  ;;  %2103 = vmatprep.mubr.msk.f32.mxu0 %vm2507_vm2, %v2506_v4 }
 0x488   :  { %2102 = vmatpush3.msra.mxu0 %v870_v32 }
 0x489   :  { %2104 = vmatmul.mubr.msk.f32.vlgmr.msra.gmra.mxu0 %vm213_vm1, %v2626_v40  ;;  %2106 = vmatprep.subr.bf16.mxu0 %v2506_v4 }
 0x48a   :  { %2107 = vmatpush3.bf16.msra.mxu0 %v2244_v33  ;;  %2122 = vmatprep.mubr.msk.bf16.mxu0 %vm2507_vm2, %v2506_v4 }
 0x48b   :  { %2108 = vmatprep.subr.bf16.mxu0 %v2506_v4 }
 0x48e   :  { %2109 = vmatpush3.bf16.msra.mxu0 %v2245_v34 }
 0x48f   :  { %2110 = vmatprep.subr.bf16.mxu0 %v2506_v4 }
 0x492   :  { %2111 = vmatpush3.bf16.msra.mxu0 %v2246_v35 }
 0x493   :  { %2112 = vmatprep.subr.bf16.mxu0 %v2506_v4 }
 0x496   :  { %2113 = vmatpush3.bf16.msra.mxu0 %v2247_v36 }
 0x497   :  { %2114 = vmatprep.subr.bf16.mxu0 %v2506_v4 }
 0x49a   :  { %2115 = vmatpush3.bf16.msra.mxu0 %v2248_v37 }
 0x49b   :  { %2116 = vmatprep.subr.bf16.mxu0 %v2506_v4 }
 0x49e   :  { %2117 = vmatpush3.bf16.msra.mxu0 %v2249_v38 }
 0x49f   :  { %2118 = vmatprep.subr.bf16.mxu0 %v2506_v4 }
 0x4a2   :  { %2119 = vmatpush3.bf16.msra.mxu0 %v2250_v39 }
 0x4a3   :  { %2120 = vmatprep.subr.bf16.mxu0 %v2506_v4 }
 0x4a6   :  { %2121 = vmatpush3.bf16.msra.mxu0 %v2251_v41  ;;  %v1672_v41 = vsub.s32 3, %v2618_v25 }
 0x4a7   :  { %2146 = vmatprep.subr.bf16.mxu0 %v2506_v4 }
 0x545   :  { %v937_v42 = vpop.f32.mrf.mxu0 }
 0x546   :  { %v1011_v44 = vmul.f32 %v2640_v12, %v937_v42  ;;  %v1274_v12 = vrot.slane %v2621_v27, %v1273_v10  ;;  %v1673_v42 = vrot.slane %v2621_v27, %v1672_v41 }
 0x547   :  { %v2100_v43 = vpop.f32.mrf.mxu0 }
 0x548   :  { %v1678_v43 = vsub.s32 7, %v2618_v25  ;;  %v2261_v25 = vld [vmem:[#allocation14 + $0x30] sm:$0xff]  }
 0x549   :  { %v1007_v45 = vpop.f32.mrf.mxu0 }
 0x54a   :  { %v1012_v46 = vadd.f32 %v1011_v44, %v1007_v45  ;;  %v1679_v45 = vrot.slane %v2621_v27, %v1678_v43  ;;  %v2262_v27 = vld [vmem:[#allocation14 + $0x28] sm:$0xff]  }
 0x54b   :  { %v2105_v47 = vpop.f32.mrf.mxu0 }
 0x54c   :  { %v1013_v48 = vmax.f32 %v1012_v46, 0.0 }
 0x54e   :  { %v1014_v49 = vpack.c.bf16 %v1013_v48, %v1013_v48  ;;  %v2260_v48 = vld [vmem:[#allocation14 + $0x38] sm:$0xff]  }
 0x550   :  { %2123 = vmatmul.mubr.bf16.vlgmr.msra.gmra.mxu0 %v1014_v49  ;;  %v2263_v49 = vld [vmem:[#allocation14 + $0x20] sm:$0xff]  }
 0x551   :  { %2162 = vmatprep.mubr.msk.bf16.mxu0 %vm2507_vm2, %v2506_v4  ;;  %2147 = vmatpush3.bf16.msra.mxu0 %v2252_v55 }
 0x552   :  { %2148 = vmatprep.subr.bf16.mxu0 %v2506_v4 }
 0x555   :  { %2149 = vmatpush3.bf16.msra.mxu0 %v2253_v56 }
 0x556   :  { %2150 = vmatprep.subr.bf16.mxu0 %v2506_v4 }
 0x559   :  { %2151 = vmatpush3.bf16.msra.mxu0 %v2254_v57 }
 0x55a   :  { %2152 = vmatprep.subr.bf16.mxu0 %v2506_v4 }
 0x55d   :  { %2153 = vmatpush3.bf16.msra.mxu0 %v2255_v58 }
 0x55e   :  { %2154 = vmatprep.subr.bf16.mxu0 %v2506_v4 }
 0x561   :  { %2155 = vmatpush3.bf16.msra.mxu0 %v2256_v59 }
 0x562   :  { %2156 = vmatprep.subr.bf16.mxu0 %v2506_v4 }
 0x565   :  { %2157 = vmatpush3.bf16.msra.mxu0 %v2257_v14 }
 0x566   :  { %2158 = vmatprep.subr.bf16.mxu0 %v2506_v4 }
 0x569   :  { %2159 = vmatpush3.bf16.msra.mxu0 %v2258_v15 }
 0x56a   :  { %2160 = vmatprep.subr.bf16.mxu0 %v2506_v4 }
 0x56d   :  { %2161 = vmatpush3.bf16.msra.mxu0 %v2259_v16 }
 0x610   :  { %v2680_v50 = vpop.f32.mrf.mxu0 }
 0x611   :  { %v1189_v51 = vmul.f32 %v2680_v50, %v2680_v50  ;;  %2127 = vmatpush3.msra.mxu1 %v2680_v50 }
 0x612   :  { %v2124_v52 = vpop.f32.mrf.mxu0  ;;  %2129 = vmatmul.mubr.msk.f32.vlgmr.msra.gmra.mxu1 %vm213_vm1, %v2604_v7  ;;  %2131 = vmatprep.subr.mxu1 %v2506_v4 }
 0x613   :  { %2132 = vmatpush3.msra.mxu1 %v1189_v51  ;;  %2133 = vmatprep.mubr.msk.f32.mxu1 %vm2507_vm2, %v2506_v4  ;;  %v2266_v51 = vld [vmem:[#allocation14 + $0x8] sm:$0xff]   ;;  %v2267_v52 = vld [vmem:[#allocation14] sm:$0xff]  }
 0x614   :  { %v1116_v53 = vpop.f32.mrf.mxu0  ;;  %2136 = vmatprep.subr.mxu1 %v2506_v4 }
 0x616   :  { %v2125_v54 = vpop.f32.mrf.mxu0  ;;  %2134 = vmatmul.mubr.msk.f32.vlgmr.msra.gmra.mxu1 %vm213_vm1, %v2604_v7 }
 0x617   :  { %2138 = vmatprep.mubr.msk.f32.mxu1 %vm2507_vm2, %v2506_v4 }
 0x6d2   :  { %v1185_v60 = vpop.f32.mrf.mxu1 }
 0x6d3   :  { %v1260_v62 = vmul.f32 %v1185_v60, %v1185_v60 }
 0x6d4   :  { %v2130_v61 = vpop.f32.mrf.mxu1 }
 0x6d5   :  { %v2004_v61 = vld [vmem:[#allocation16 + $0x10] ss:$0 sm:$0xff] }
 0x6d6   :  { %v1256_v63 = vpop.f32.mrf.mxu1 }
 0x6d7   :  { %v1261_v0 = vsub.f32 %v1256_v63, %v1260_v62 }
 0x6d8   :  { %v2135_v1 = vpop.f32.mrf.mxu1 }
 0x6d9   :  { %v1262_v2 = vmax.f32 %v1261_v0, 0.0 }
 0x6db   :  { %v1263_v3 = vadd.f32 1e-05, %v1262_v2 }
 0x6dd   :  { %2274 = vrsqrt.f32 %v1263_v3 }
 0x6ea   :  { %v2275_v5 = vpop.eup %2274 }
 0x6eb   :  { %v1269_v11 = vmul.f32 %v2275_v5, %v1268_v9 }
 0x6ed   :  { %2137 = vmatpush3.msra.mxu1 %v1269_v11  ;;  %v1270_v6 = vmul.f32 %v1269_v11, %v1185_v60 }
 0x6ee   :  { %2139 = vmatmul.mubr.msk.f32.vlgmr.msra.gmra.mxu1 %vm213_vm1, %v2626_v40  ;;  %2141 = vmatprep.subr.mxu1 %v2506_v4 }
 0x6ef   :  { %v1275_v13 = vsub.f32 %v1274_v12, %v1270_v6  ;;  %2143 = vmatprep.mubr.msk.f32.mxu1 %vm2507_vm2, %v2506_v4 }
 0x6f1   :  { %2142 = vmatpush3.msra.mxu1 %v1275_v13 }
 0x6f2   :  { %2144 = vmatmul.mubr.msk.f32.vlgmr.msra.gmra.mxu1 %vm213_vm1, %v2626_v40  ;;  %2166 = vmatprep.subr.mxu1 %v2506_v4 }
 0x6f3   :  { %2168 = vmatprep.mubr.msk.f32.mxu1 %vm2507_vm2, %v2506_v4 }
 0x7ae   :  { %v1342_v17 = vpop.f32.mrf.mxu1 }
 0x7af   :  { %v1416_v19 = vmul.f32 %v1342_v17, %v2680_v50  ;;  %v2264_v50 = vld [vmem:[#allocation14 + $0x18] sm:$0xff]  }
 0x7b0   :  { %v2140_v18 = vpop.f32.mrf.mxu1 }
 0x7b2   :  { %v1412_v20 = vpop.f32.mrf.mxu1 }
 0x7b3   :  { %v1417_v21 = vadd.f32 %v1416_v19, %v1412_v20 }
 0x7b4   :  { %v2145_v22 = vpop.f32.mrf.mxu1 }
 0x7b5   :  { %v1418_v23 = vmax.f32 %v1417_v21, 0.0 }
 0x7b7   :  { %v1419_v24 = vpack.c.bf16 %v1418_v23, %v1418_v23 }
 0x7b9   :  { %2163 = vmatmul.mubr.bf16.vlgmr.msra.gmra.mxu0 %v1419_v24 }
 0x879   :  { %v2717_v26 = vpop.f32.mrf.mxu0 }
 0x87a   :  { %v1594_v28 = vmul.f32 %v2717_v26, %v2717_v26  ;;  %2167 = vmatpush3.msra.mxu1 %v2717_v26 }
 0x87b   :  { %v2164_v29 = vpop.f32.mrf.mxu0  ;;  %2169 = vmatmul.mubr.msk.f32.vlgmr.msra.gmra.mxu1 %vm213_vm1, %v2604_v7  ;;  %2171 = vmatprep.subr.mxu1 %v2506_v4 }
 0x87c   :  { %2172 = vmatpush3.msra.mxu1 %v1594_v28  ;;  %2173 = vmatprep.mubr.msk.f32.mxu1 %vm2507_vm2, %v2506_v4 }
 0x87d   :  { %v1521_v30 = vpop.f32.mrf.mxu0  ;;  %2176 = vmatprep.subr.mxu1 %v2506_v4 }
 0x87f   :  { %v2165_v31 = vpop.f32.mrf.mxu0  ;;  %2174 = vmatmul.mubr.msk.f32.vlgmr.msra.gmra.mxu1 %vm213_vm1, %v2604_v7 }
 0x880   :  { %2178 = vmatprep.mubr.msk.f32.mxu1 %vm2507_vm2, %v2506_v4 }
 0x93b   :  { %v1590_v32 = vpop.f32.mrf.mxu1 }
 0x93c   :  { %v1665_v34 = vmul.f32 %v1590_v32, %v1590_v32 }
 0x93d   :  { %v2170_v33 = vpop.f32.mrf.mxu1 }
 0x93f   :  { %v1661_v35 = vpop.f32.mrf.mxu1 }
 0x940   :  { %v1666_v36 = vsub.f32 %v1661_v35, %v1665_v34 }
 0x941   :  { %v2175_v37 = vpop.f32.mrf.mxu1 }
 0x942   :  { %v1667_v38 = vmax.f32 %v1666_v36, 0.0 }
 0x944   :  { %v1668_v39 = vadd.f32 1e-05, %v1667_v38 }
 0x946   :  { %2276 = vrsqrt.f32 %v1668_v39 }
 0x953   :  { %v2277_v44 = vpop.eup %2276 }
 0x954   :  { %v1674_v7 = vmul.f32 %v2277_v44, %v1673_v42 }
 0x956   :  { %2177 = vmatpush3.msra.mxu1 %v1674_v7  ;;  %v1675_v46 = vmul.f32 %v1674_v7, %v1590_v32 }
 0x957   :  { %2179 = vmatmul.mubr.msk.f32.vlgmr.msra.gmra.mxu1 %vm213_vm1, %v2626_v40  ;;  %2181 = vmatprep.subr.mxu1 %v2506_v4 }
 0x958   :  { %v1680_v47 = vsub.f32 %v1679_v45, %v1675_v46  ;;  %2183 = vmatprep.mubr.msk.f32.mxu1 %vm2507_vm2, %v2506_v4 }
 0x95a   :  { %2182 = vmatpush3.msra.mxu1 %v1680_v47 }
 0x95b   :  { %2184 = vmatmul.mubr.msk.f32.vlgmr.msra.gmra.mxu1 %vm213_vm1, %v2626_v40  ;;  %2186 = vmatprep.subr.bf16.mxu1 %v2506_v4  ;;  %v2265_v40 = vld [vmem:[#allocation14 + $0x10] sm:$0xff]  }
 0x95c   :  { %2187 = vmatpush3.bf16.msra.mxu1 %v2260_v48  ;;  %2202 = vmatprep.mubr.msk.bf16.mxu1 %vm2507_vm2, %v2506_v4 }
 0x95d   :  { %2188 = vmatprep.subr.bf16.mxu1 %v2506_v4 }
 0x960   :  { %2189 = vmatpush3.bf16.msra.mxu1 %v2261_v25 }
 0x961   :  { %2190 = vmatprep.subr.bf16.mxu1 %v2506_v4 }
 0x964   :  { %2191 = vmatpush3.bf16.msra.mxu1 %v2262_v27 }
 0x965   :  { %2192 = vmatprep.subr.bf16.mxu1 %v2506_v4 }
 0x968   :  { %2193 = vmatpush3.bf16.msra.mxu1 %v2263_v49 }
 0x969   :  { %2194 = vmatprep.subr.bf16.mxu1 %v2506_v4 }
 0x96c   :  { %2195 = vmatpush3.bf16.msra.mxu1 %v2264_v50 }
 0x96d   :  { %2196 = vmatprep.subr.bf16.mxu1 %v2506_v4 }
 0x970   :  { %2197 = vmatpush3.bf16.msra.mxu1 %v2265_v40 }
 0x971   :  { %2198 = vmatprep.subr.bf16.mxu1 %v2506_v4 }
 0x974   :  { %2199 = vmatpush3.bf16.msra.mxu1 %v2266_v51 }
 0x975   :  { %2200 = vmatprep.subr.bf16.mxu1 %v2506_v4 }
 0x978   :  { %2201 = vmatpush3.bf16.msra.mxu1 %v2267_v52 }
 0xa17   :  { %v1747_v53 = vpop.f32.mrf.mxu1 }
 0xa18   :  { %v1821_v55 = vmul.f32 %v1747_v53, %v2717_v26 }
 0xa19   :  { %v2180_v54 = vpop.f32.mrf.mxu1 }
 0xa1b   :  { %v1817_v56 = vpop.f32.mrf.mxu1 }
 0xa1c   :  { %v1822_v57 = vadd.f32 %v1821_v55, %v1817_v56 }
 0xa1d   :  { %v2185_v58 = vpop.f32.mrf.mxu1 }
 0xa1e   :  { %v1823_v59 = vmax.f32 %v1822_v57, 0.0 }
 0xa20   :  { %v1824_v60 = vpack.c.bf16 %v1823_v59, %v1823_v59 }
 0xa22   :  { %2203 = vmatmul.mubr.bf16.vlgmr.msra.gmra.mxu1 %v1824_v60 }
 0xae2   :  { %v1927_v62 = vpop.f32.mrf.mxu1 }
 0xae3   :  { %v1928_v63 = vadd.f32 %v2004_v61, %v1927_v62 }
 0xae4   :  { %v2204_v0 = vpop.f32.mrf.mxu1 }
 0xae5   :  { %1933 = vst [vmem:[#allocation17] sm:$0xff] %v1928_v63 }
 0xae6   :  { %v1930_v4 = vpop.f32.mrf.mxu1 }
 0xae7   :  { %2469 = shalt.err (!%p2466_p7)
}
 0xae8   :  { %1943 = dma.vmem_to_hbm [thread:$0]  %s1941_s8, 128, %s2766_s9, [#allocation4]   ;;  %v2205_v1 = vpop.f32.mrf.mxu1 }
 0xae9   :  { %2488 = dma.done.wait [#allocation4], 128  }
 0xaea   :  { %2489 = vsyncadd [#allocation4], 4294967168 }
 0xaeb   :  { %1947 = vsyncpa [#allocation3], 1 }
 0xaec   :  { %1948 = vsyncpa [#allocation6], 1 }
 0xaed   :  { %1949 = vsyncpa [#allocation9], 1 }
 0xaee   :  { %1950 = vsyncpa [#allocation12], 1 }
 0xaef   :  { %1951 = vsyncpa [#allocation15], 1 }
 0xaf0   :  { %1952 = vsyncpa [#allocation4], 1 }

</bundles_post_ra>
